<compile_context>
chip_gen: v5e
topology: v5e:2x2
jax: 0.10.0
libtpu: 0.0.40
codegen_flags: <defaults>
</compile_context>

<pallas_src>
import numpy as np
import jax
import jax.numpy as jnp
from jax.experimental import pallas as pl
from jax.experimental.pallas import tpu as pltpu


# ------------------------------ fused kernel -------------------------------- #
def _csa_kernel(mask_ref, x_ref, w1_ref, b1_ref, w2_ref, b2_ref,
                r_ref, psum_ref, acc_ref):
    """Encoder + masked group sums for one (core, batch-tile) grid point."""
    i = pl.program_id(1)                      # inner (accumulation) axis over tiles

    @pl.when(i == 0)
    def _():
        acc_ref[...] = jnp.zeros_like(acc_ref)

    # ---- encoder: bf16 MXU operands, f32 accumulation & elementwise ----
    h = jnp.dot(x_ref[...], w1_ref[...], preferred_element_type=jnp.float32)
    h = jnp.maximum(h + b1_ref[...], 0.0)
    r = jnp.dot(h.astype(w2_ref.dtype), w2_ref[...],
                preferred_element_type=jnp.float32)
    r = r + b2_ref[...]

    # bf16 writeback (halves r's HBM traffic); reuse the same bf16 value below
    r_bf16 = r.astype(r_ref.dtype)
    r_ref[...] = r_bf16

    # ---- masked group sums on the MXU: (2, tb) @ (tb, H) -> (2, H), f32 acc ----
    acc_ref[...] += jnp.dot(mask_ref[...], r_bf16,
                            preferred_element_type=jnp.float32)

    # emit this core's partial group sums on its last batch tile
    @pl.when(i == pl.num_programs(1) - 1)
    def _():
        psum_ref[...] = acc_ref[...][None]


# ------------------------------- CSA forward -------------------------------- #
def csa_forward(x, a_np, params, *, tb=1024, ncores=2):
    """r = encoder(x); r0 = r[a==0]; r1 = r[a==1]; t = decoder(r0, r1).

    API contract: `a_np` must be host-static (NumPy); masks / row permutation are
    built on the host because the boolean split has a data-dependent output shape.
    """
    B, D_in = x.shape
    H = params["w2"].shape[1]

    a_np = np.asarray(a_np)
    idx0 = np.nonzero(a_np == 0)[0]
    idx1 = np.nonzero(a_np == 1)[0]
    n0, n1 = int(idx0.size), int(idx1.size)
    perm = np.concatenate([idx0, idx1])       # group-0 rows first, then group-1

    # ---- tiling: per-core batch slab, tile multiple of 128 (lane-dense masks) ----
    ncores = max(1, int(ncores))
    per_core = -(-B // ncores)
    tb = min(int(tb), 2048)                              # VMEM headroom (v7x 64 MiB)
    tb = max(128, min(tb, -(-per_core // 128) * 128))    # whole slab if B is small
    nb_inner = -(-per_core // tb)
    B_pad = ncores * nb_inner * tb

    # ---- host-side permutation of x (cheap, bf16) + zero padding ----
    xb = x.astype(jnp.bfloat16)
    xb = jnp.take(xb, jnp.asarray(perm), axis=0)
    if B_pad != B:
        xb = jnp.pad(xb, ((0, B_pad - B), (0, 0)))

    # contiguous 0/1 block masks (exact in bf16); padded rows get zero weight
    masks_np = np.zeros((2, B_pad), dtype=np.float32)
    masks_np[0, :n0] = 1.0
    masks_np[1, n0:n0 + n1] = 1.0
    masks = jnp.asarray(masks_np, dtype=jnp.bfloat16)

    w1 = params["w1"].astype(jnp.bfloat16)
    w2 = params["w2"].astype(jnp.bfloat16)

    full = lambda arr: pl.BlockSpec(arr.shape, lambda c, i: (0,) * arr.ndim)

    r_perm, psum = pl.pallas_call(
        _csa_kernel,
        out_shape=(jax.ShapeDtypeStruct((B_pad, H), jnp.bfloat16),
                   jax.ShapeDtypeStruct((ncores, 2, H), jnp.float32)),
        grid=(ncores, nb_inner),
        in_specs=[
            pl.BlockSpec((2, tb), lambda c, i: (0, c * nb_inner + i)),     # masks
            pl.BlockSpec((tb, D_in), lambda c, i: (c * nb_inner + i, 0)),  # x tile
            full(w1), full(params["b1"]),                                  # W1, b1
            full(w2), full(params["b2"]),                                  # W2, b2
        ],
        out_specs=(
            pl.BlockSpec((tb, H), lambda c, i: (c * nb_inner + i, 0)),     # r tile
            pl.BlockSpec((1, 2, H), lambda c, i: (c, 0, 0)),               # partial sums
        ),
        scratch_shapes=[pltpu.VMEM((2, H), jnp.float32)],
        compiler_params=pltpu.CompilerParams(
            # outer axis: independent batch halves (megacore-parallel on v7x);
            # inner axis carries the group-sum accumulation -> arbitrary.
            dimension_semantics=("parallel", "arbitrary")),
    )(masks, xb, w1, params["b1"], w2, params["b2"])

    # ---- tiny decoder outside the kernel, on the reduced partial sums ----
    # TODO(synk): empty groups are clamped to N_g>=1 (zero mean) instead of the
    # NaN a true mean-of-empty would give in the PyTorch reference.
    sums = psum.sum(axis=0)                                            # (2, H)
    inv_n = jnp.asarray([[1.0 / max(n0, 1)], [1.0 / max(n1, 1)]],
                        dtype=jnp.float32)
    means = sums * inv_n                                               # (2, H)
    wd = jnp.concatenate([params["wd0"], params["wd1"]], axis=0)       # (2H, D_out)
    t = means.reshape(1, 2 * H) @ wd + params["bd"]                    # (1, D_out)

    # contiguous slices -> no gather on r
    r0 = r_perm[:n0]
    r1 = r_perm[n0:n0 + n1]
    return t, r0, r1


# --------------------------------- driver ----------------------------------- #
if __name__ == "__main__":
    # lane-dense feature dims (multiples of 128); B=384 exercises padding + 2 cores
    B, D_in, H, D_out = 384, 128, 128, 128

    key = jax.random.PRNGKey(0)
    (k_x, k_w1, k_b1, k_w2, k_b2,
     k_wd0, k_wd1, k_bd, k_a) = jax.random.split(key, 9)

    x = jax.random.normal(k_x, (B, D_in), dtype=jnp.float32)

    params = {
        "w1": jax.random.normal(k_w1, (D_in, H), dtype=jnp.float32) * 0.1,
        "b1": jax.random.normal(k_b1, (1, H), dtype=jnp.float32) * 0.1,
        "w2": jax.random.normal(k_w2, (H, H), dtype=jnp.float32) * 0.1,
        "b2": jax.random.normal(k_b2, (1, H), dtype=jnp.float32) * 0.1,
        "wd0": jax.random.normal(k_wd0, (H, D_out), dtype=jnp.float32) * 0.1,
        "wd1": jax.random.normal(k_wd1, (H, D_out), dtype=jnp.float32) * 0.1,
        "bd": jax.random.normal(k_bd, (1, D_out), dtype=jnp.float32) * 0.1,
    }

    # deterministic binary group labels (both groups non-empty)
    a_np = np.array(jax.random.bernoulli(k_a, 0.5, (B,)).astype(np.int32))
    if a_np.sum() == 0:
        a_np[0] = 1
    if a_np.sum() == B:
        a_np[0] = 0

    t, r0, r1 = csa_forward(x, a_np, params)
    jax.block_until_ready((t, r0, r1))

    # ---------- reference (same bf16-operand / f32-accumulate math) ----------
    xb = x.astype(jnp.bfloat16)
    w1b = params["w1"].astype(jnp.bfloat16)
    w2b = params["w2"].astype(jnp.bfloat16)
    h_ref = jnp.maximum(jnp.dot(xb, w1b, preferred_element_type=jnp.float32)
                        + params["b1"], 0.0)
    r_ref_f32 = jnp.dot(h_ref.astype(jnp.bfloat16), w2b,
                        preferred_element_type=jnp.float32) + params["b2"]
    r_ref = r_ref_f32.astype(jnp.bfloat16)                      # kernel emits bf16 r
    idx0 = np.nonzero(a_np == 0)[0]
    idx1 = np.nonzero(a_np == 1)[0]
    r0_ref = r_ref[idx0]
    r1_ref = r_ref[idx1]
    rf = r_ref.astype(jnp.float32)
    t_ref = (rf[idx0].mean(0, keepdims=True) @ params["wd0"]
             + rf[idx1].mean(0, keepdims=True) @ params["wd1"] + params["bd"])

    assert r0.shape == r0_ref.shape and r1.shape == r1_ref.shape
    assert jnp.allclose(r0.astype(jnp.float32), r0_ref.astype(jnp.float32),
                        atol=2e-2, rtol=2e-2), "r0 mismatch"
    assert jnp.allclose(r1.astype(jnp.float32), r1_ref.astype(jnp.float32),
                        atol=2e-2, rtol=2e-2), "r1 mismatch"
    assert jnp.allclose(t, t_ref, atol=2e-2, rtol=2e-2), "t mismatch"

    print("KERNEL_OK")
</pallas_src>

<mosaic_0001>
module attributes {stable_mosaic.version = 11 : i64} {
  func.func @_csa_kernel(%arg0: i32, %arg1: i32, %arg2: memref<2x256xbf16, #tpu.memory_space<vmem>>, %arg3: memref<256x128xbf16, #tpu.memory_space<vmem>>, %arg4: memref<128x128xbf16, #tpu.memory_space<vmem>>, %arg5: memref<1x128xf32, #tpu.memory_space<vmem>>, %arg6: memref<128x128xbf16, #tpu.memory_space<vmem>>, %arg7: memref<1x128xf32, #tpu.memory_space<vmem>>, %arg8: memref<256x128xbf16, #tpu.memory_space<vmem>>, %arg9: memref<1x2x128xf32, #tpu.memory_space<vmem>>, %arg10: memref<2x128xf32, #tpu.memory_space<vmem>>) attributes {dimension_semantics = [#tpu.dimension_semantics<parallel>, #tpu.dimension_semantics<arbitrary>], iteration_bounds = array<i64: 2, 1>, scalar_prefetch = 0 : i64, scratch_operands = 1 : i64, tpu.core_type = #tpu.core_type<tc>, window_params = [{transform_indices = @transform_0, window_bounds = array<i64: 2, 256>}, {transform_indices = @transform_1, window_bounds = array<i64: 256, 128>}, {pipeline_mode = #tpu.pipeline_mode<synchronous>, transform_indices = @transform_2, window_bounds = array<i64: 128, 128>}, {pipeline_mode = #tpu.pipeline_mode<synchronous>, transform_indices = @transform_3, window_bounds = array<i64: 1, 128>}, {pipeline_mode = #tpu.pipeline_mode<synchronous>, transform_indices = @transform_4, window_bounds = array<i64: 128, 128>}, {pipeline_mode = #tpu.pipeline_mode<synchronous>, transform_indices = @transform_5, window_bounds = array<i64: 1, 128>}, {transform_indices = @transform_6, window_bounds = array<i64: 256, 128>}, {transform_indices = @transform_7, window_bounds = array<i64: 1, 2, 128>}]} {
    %c0_i32 = arith.constant 0 : i32
    %0 = arith.cmpi eq, %arg1, %c0_i32 : i32
    %1 = arith.extui %0 : i1 to i32
    %c0_i32_0 = arith.constant 0 : i32
    %2 = arith.cmpi ne, %1, %c0_i32_0 : i32
    scf.if %2 {
      %cst_23 = arith.constant 0.000000e+00 : f32
      %27 = vector.broadcast %cst_23 : f32 to vector<2x128xf32>
      %c0_24 = arith.constant 0 : index
      %c0_25 = arith.constant 0 : index
      %28 = vector.load %arg10[%c0_24, %c0_25] : memref<2x128xf32, #tpu.memory_space<vmem>>, vector<2x128xf32>
      tpu.vector_store %arg10[%c0_24, %c0_25], %27 {strides = array<i32>} : memref<2x128xf32, #tpu.memory_space<vmem>>, vector<2x128xf32>,
    } else {
    }
    %c0 = arith.constant 0 : index
    %c0_1 = arith.constant 0 : index
    %3 = vector.load %arg3[%c0, %c0_1] : memref<256x128xbf16, #tpu.memory_space<vmem>>, vector<256x128xbf16>
    %c0_2 = arith.constant 0 : index
    %c0_3 = arith.constant 0 : index
    %4 = vector.load %arg4[%c0_2, %c0_3] : memref<128x128xbf16, #tpu.memory_space<vmem>>, vector<128x128xbf16>
    %cst = arith.constant dense<0.000000e+00> : vector<256x128xf32>
    %5 = tpu.matmul %3, %4, %cst {dimension_numbers = #tpu.dot_dimension_numbers<[1], [0], [0], [1], [0, 0, 1, 1], [], []>} : vector<256x128xbf16>, vector<128x128xbf16>, vector<256x128xf32> -> vector<256x128xf32>
    %c0_4 = arith.constant 0 : index
    %c0_5 = arith.constant 0 : index
    %6 = vector.load %arg5[%c0_4, %c0_5] : memref<1x128xf32, #tpu.memory_space<vmem>>, vector<1x128xf32>
    %7 = vector.broadcast %6 : vector<1x128xf32> to vector<256x128xf32>
    %8 = arith.addf %5, %7 : vector<256x128xf32>
    %cst_6 = arith.constant 0.000000e+00 : f32
    %9 = vector.broadcast %cst_6 : f32 to vector<256x128xf32>
    %10 = arith.maximumf %8, %9 : vector<256x128xf32>
    %11 = arith.truncf %10 : vector<256x128xf32> to vector<256x128xbf16>
    %c0_7 = arith.constant 0 : index
    %c0_8 = arith.constant 0 : index
    %12 = vector.load %arg6[%c0_7, %c0_8] : memref<128x128xbf16, #tpu.memory_space<vmem>>, vector<128x128xbf16>
    %cst_9 = arith.constant dense<0.000000e+00> : vector<256x128xf32>
    %13 = tpu.matmul %11, %12, %cst_9 {dimension_numbers = #tpu.dot_dimension_numbers<[1], [0], [0], [1], [0, 0, 1, 1], [], []>} : vector<256x128xbf16>, vector<128x128xbf16>, vector<256x128xf32> -> vector<256x128xf32>
    %c0_10 = arith.constant 0 : index
    %c0_11 = arith.constant 0 : index
    %14 = vector.load %arg7[%c0_10, %c0_11] : memref<1x128xf32, #tpu.memory_space<vmem>>, vector<1x128xf32>
    %15 = vector.broadcast %14 : vector<1x128xf32> to vector<256x128xf32>
    %16 = arith.addf %13, %15 : vector<256x128xf32>
    %17 = arith.truncf %16 : vector<256x128xf32> to vector<256x128xbf16>
    %c0_12 = arith.constant 0 : index
    %c0_13 = arith.constant 0 : index
    %18 = vector.load %arg8[%c0_12, %c0_13] : memref<256x128xbf16, #tpu.memory_space<vmem>>, vector<256x128xbf16>
    tpu.vector_store %arg8[%c0_12, %c0_13], %17 {strides = array<i32>} : memref<256x128xbf16, #tpu.memory_space<vmem>>, vector<256x128xbf16>,
    %c0_14 = arith.constant 0 : index
    %c0_15 = arith.constant 0 : index
    %19 = vector.load %arg10[%c0_14, %c0_15] : memref<2x128xf32, #tpu.memory_space<vmem>>, vector<2x128xf32>
    %c0_16 = arith.constant 0 : index
    %c0_17 = arith.constant 0 : index
    %20 = vector.load %arg2[%c0_16, %c0_17] : memref<2x256xbf16, #tpu.memory_space<vmem>>, vector<2x256xbf16>
    %cst_18 = arith.constant dense<0.000000e+00> : vector<2x128xf32>
    %21 = tpu.matmul %20, %17, %cst_18 {dimension_numbers = #tpu.dot_dimension_numbers<[1], [0], [0], [1], [0, 0, 1, 1], [], []>} : vector<2x256xbf16>, vector<256x128xbf16>, vector<2x128xf32> -> vector<2x128xf32>
    %22 = arith.addf %19, %21 : vector<2x128xf32>
    %c0_19 = arith.constant 0 : index
    %c0_20 = arith.constant 0 : index
    %23 = vector.load %arg10[%c0_19, %c0_20] : memref<2x128xf32, #tpu.memory_space<vmem>>, vector<2x128xf32>
    tpu.vector_store %arg10[%c0_19, %c0_20], %22 {strides = array<i32>} : memref<2x128xf32, #tpu.memory_space<vmem>>, vector<2x128xf32>,
    %c0_i32_21 = arith.constant 0 : i32
    %24 = arith.cmpi eq, %arg1, %c0_i32_21 : i32
    %25 = arith.extui %24 : i1 to i32
    %c0_i32_22 = arith.constant 0 : i32
    %26 = arith.cmpi ne, %25, %c0_i32_22 : i32
    scf.if %26 {
      %c0_23 = arith.constant 0 : index
      %c0_24 = arith.constant 0 : index
      %27 = vector.load %arg10[%c0_23, %c0_24] : memref<2x128xf32, #tpu.memory_space<vmem>>, vector<2x128xf32>
      %28 = vector.shape_cast %27 : vector<2x128xf32> to vector<1x2x128xf32>
      %c0_25 = arith.constant 0 : index
      %c0_26 = arith.constant 0 : index
      %c0_27 = arith.constant 0 : index
      %29 = vector.load %arg9[%c0_25, %c0_26, %c0_27] : memref<1x2x128xf32, #tpu.memory_space<vmem>>, vector<1x2x128xf32>
      tpu.vector_store %arg9[%c0_25, %c0_26, %c0_27], %28 {strides = array<i32>} : memref<1x2x128xf32, #tpu.memory_space<vmem>>, vector<1x2x128xf32>,
    } else {
    }
    return
  }
  func.func @transform_0(%arg0: i32, %arg1: i32) -> (i32, i32) {
    %c1_i32 = arith.constant 1 : i32
    %0 = arith.muli %arg0, %c1_i32 : i32
    %1 = arith.addi %0, %arg1 : i32
    %c0_i32 = arith.constant 0 : i32
    %c0_i32_0 = arith.constant 0 : i32
    return %c0_i32, %1 : i32, i32
  }
  func.func @transform_1(%arg0: i32, %arg1: i32) -> (i32, i32) {
    %c1_i32 = arith.constant 1 : i32
    %0 = arith.muli %arg0, %c1_i32 : i32
    %1 = arith.addi %0, %arg1 : i32
    %c0_i32 = arith.constant 0 : i32
    %c0_i32_0 = arith.constant 0 : i32
    return %1, %c0_i32 : i32, i32
  }
  func.func @transform_2(%arg0: i32, %arg1: i32) -> (i32, i32) {
    %c0_i32 = arith.constant 0 : i32
    %c0_i32_0 = arith.constant 0 : i32
    %c0_i32_1 = arith.constant 0 : i32
    return %c0_i32, %c0_i32_0 : i32, i32
  }
  func.func @transform_3(%arg0: i32, %arg1: i32) -> (i32, i32) {
    %c0_i32 = arith.constant 0 : i32
    %c0_i32_0 = arith.constant 0 : i32
    %c0_i32_1 = arith.constant 0 : i32
    return %c0_i32, %c0_i32_0 : i32, i32
  }
  func.func @transform_4(%arg0: i32, %arg1: i32) -> (i32, i32) {
    %c0_i32 = arith.constant 0 : i32
    %c0_i32_0 = arith.constant 0 : i32
    %c0_i32_1 = arith.constant 0 : i32
    return %c0_i32, %c0_i32_0 : i32, i32
  }
  func.func @transform_5(%arg0: i32, %arg1: i32) -> (i32, i32) {
    %c0_i32 = arith.constant 0 : i32
    %c0_i32_0 = arith.constant 0 : i32
    %c0_i32_1 = arith.constant 0 : i32
    return %c0_i32, %c0_i32_0 : i32, i32
  }
  func.func @transform_6(%arg0: i32, %arg1: i32) -> (i32, i32) {
    %c1_i32 = arith.constant 1 : i32
    %0 = arith.muli %arg0, %c1_i32 : i32
    %1 = arith.addi %0, %arg1 : i32
    %c0_i32 = arith.constant 0 : i32
    %c0_i32_0 = arith.constant 0 : i32
    return %1, %c0_i32 : i32, i32
  }
  func.func @transform_7(%arg0: i32, %arg1: i32) -> (i32, i32, i32) {
    %c0_i32 = arith.constant 0 : i32
    %c0_i32_0 = arith.constant 0 : i32
    %c0_i32_1 = arith.constant 0 : i32
    return %arg0, %c0_i32, %c0_i32_0 : i32, i32, i32
  }
}

</mosaic_0001>

<bundles_post_ra>
// kernel: tpu_custom_call.1
= control target key start
LH: loop header
LB: loop body
LE: loop exit
PB: predicated region body
PF: predicated region fallthrough
CT: control target
= control target key end

     0   :  { %s2387_s0 = inlined_call_operand.hbm [shape: bf16[2,512], index: 0, kind: input, shape index: {}]   ;;  %s2388_s1 = inlined_call_operand.hbm [shape: bf16[512,128], index: 1, kind: input, shape index: {}]   ;;  %s2389_s2 = inlined_call_operand.hbm [shape: bf16[128,128], index: 2, kind: input, shape index: {}]   ;;  %s2390_s3 = inlined_call_operand.vmem [shape: f32[1,128], index: 3, kind: input, shape index: {}]   ;;  %s2391_s4 = inlined_call_operand.hbm [shape: bf16[128,128], index: 4, kind: input, shape index: {}]   ;;  %s2392_s5 = inlined_call_operand.vmem [shape: f32[1,128], index: 5, kind: input, shape index: {}]   ;;  %s2393_s6 = inlined_call_operand.hbm [shape: bf16[512,128], index: 6, kind: output, shape index: {0}]   ;;  %s2394_s7 = inlined_call_operand.hbm [shape: f32[2,2,128], index: 7, kind: output, shape index: {1}]  }
   0x1   :  { %2402 = sst [smem:[#allocation25_spill]] %s2389_s2 }
   0x2   :  { %2403 = sst [smem:[#allocation26_spill]] %s2391_s4 }
   0x3   :  { %2404 = sst [smem:[#allocation27_spill]] %s2394_s7 }
   0x4   :  { %13 = vsyncpa [#allocation4], 0 }
   0x5   :  { %15 = vsyncpa [#allocation4 + $0x1], 0 }
   0x6   :  { %16 = vsyncpa [#allocation7], 0 }
   0x7   :  { %18 = vsyncpa [#allocation7 + $0x1], 0 }
   0x8   :  { %19 = vsyncpa [#allocation10], 0 }
   0x9   :  { %20 = vsyncpa [#allocation5], 0 }
   0xa   :  { %22 = vsyncpa [#allocation5 + $0x1], 0 }
   0xb   :  { %23 = vsyncpa [#allocation13], 0 }
   0xc   :  { %25 = vsyncpa [#allocation13 + $0x1], 0  ;;  %s1992_s24 = smov 0   ;;  %s1994_s25 = smov 0  }
   0xd   :  { %s1996_s26 = smov 0   ;;  %s1998_s27 = smov 0  }
   0xe   :  { %s2000_s28 = smov 0   ;;  %s2002_s29 = smov 0  }
   0xf LB: > { %2405 = sst [smem:[#allocation20_spill]] %s1923_s24  ;;  %s2023_s30 = sadd.s32 4294967295, %s1943_s29   ;;  %s1943_s29 = sphi %s2002_s29, %s31_s29   ;;  %s1939_s28 = sphi %s2000_s28, %s2428_s28   ;;  %s1935_s27 = sphi %s1998_s27, %s2427_s27   ;;  %s1931_s26 = sphi %s1996_s26, %s2423_s26   ;;  %s1927_s25 = sphi %s1994_s25, %s2426_s25   ;;  %s1923_s24 = sphi %s1992_s24, %s2425_s24  }
  0x10   : > { %2406 = sst [smem:[#allocation21_spill]] %s1931_s26  ;;  %p1301_p0 = scmp.ge.s32.totalorder %s1943_s29, 1 }
  0x11   : > { %p66_p1 = scmp.eq.s32.totalorder %s2023_s30, 0  ;;  %p242_p2 = scmp.lt.s32.totalorder %s1943_s29, 3 }
  0x12   : > { %s2407_s2 = sld [smem:[#allocation25_spill]]  ;;  %s1945_s12 = smov [#allocation8]  }
  0x13   : > { %p2031_p3 = pnand %p1301_p0, %p242_p2  ;;  %s255_s13 = sshll.u32 %s1945_s12, 4  ;;  %s256_s13 = int_to_ptr.vmem [resolvable:$true] %s255_s13 }
  0x14   : > { %p1304_p6 = scmp.ge.s32.totalorder %s1943_s29, 2  ;;  %s2409_s4 = sld [smem:[#allocation26_spill]] }
  0x15   : > { %p1613_p4 = pneg %p2031_p3  ;;  %s2395_s17 = smov 64  }
  0x16   : > { %s2396_s18 = smov 4   ;;  %s1948_s19 = smov [#allocation9]  }
  0x17   : > { %p1614_p5 = pnand %p1613_p4, %p66_p1  ;;  %s272_s20 = sshll.u32 %s1948_s19, 4  ;;  %s273_s20 = int_to_ptr.vmem [resolvable:$true] %s272_s20 }
  0x18   : > { %s253_s10 = sshll.u32 %s2407_s2, 4  ;;  %s1300_s21 = sadd.s32 4294967294, %s1943_s29   ;;  %s254_s10 = int_to_ptr.hbm [resolvable:$true] %s253_s10 }
  0x19   : > { %1616 = dma.hbm_to_vmem [thread:$0]  (!%p1614_p5), %s254_s10, 1024, %s256_s13, [#allocation7], %s2395_s17, %s2395_s17, %s2396_s18  }
  0x1a   : > { %s270_s16 = sshll.u32 %s2409_s4, 4  ;;  %s43_s22 = sadd.s32 1, %s1939_s28  ;;  %s271_s16 = int_to_ptr.hbm [resolvable:$true] %s270_s16 }
  0x1b   : > { %1619 = dma.hbm_to_vmem [thread:$0]  (!%p1614_p5), %s271_s16, 1024, %s273_s20, [#allocation10], %s2395_s17, %s2395_s17, %s2396_s18  }
  0x1c   : > { %p45_p7 = scmp.ge.s32.totalorder %s43_s22, 2  ;;  %s52_s23 = sadd.s32 1, %s1931_s26 }
  0x1d   : > { %p59_p8 = scmp.ne.s32.totalorder %s1931_s26, %s1927_s25  ;;  %p60_p9 = scmp.eq.s32.totalorder %s1943_s29, 0 }
  0x1e   : > { %s2430_s22 = smov (%p45_p7, %s43_s22), 0  ;;  %p65_p11 = scmp.ne.s32.totalorder %s1927_s25, %s1923_s24 }
  0x1f   : > { %2410 = sst [smem:[#allocation22_spill]] %s2430_s22  ;;  %p2057_p10 = por %p60_p9, %p59_p8 }
  0x20   : > { %s49_s9 = ssub.s32 %s1939_s28, %s2430_s22  ;;  %p203_p12 = scmp.eq.s32.totalorder %s2023_s30, 1 }
  0x21   : > { %p50_p13 = scmp.eq.s32.totalorder %s49_s9, 0  ;;  %p2068_p0 = por %p66_p1, %p65_p11 }
  0x22   : > { %p2072_p2 = por %p203_p12, %p59_p8  ;;  %p209_p4 = scmp.eq.s32.totalorder %s1300_s21, 1 }
  0x23   : > { %s2077_s13 = scalar_select %p50_p13, %s1931_s26, %s52_s23  }
  0x24   : > { %p2079_p5 = por %p209_p4, %p65_p11  ;;  %p1636_p7 = scmp.lt.s32.totalorder %s1943_s29, 2 }
  0x25   : > { %2414 = sst [smem:[#allocation23_spill]] %s2077_s13  ;;  %s289_s15 = sand.u32 1, %s1931_s26  }
  0x26   : > { %s2415_s14 = scalar_select %p2079_p5, 1, 0 }
  0x27   : > { %s1306_s16 = sshll.u32 %s1939_s28, 1  ;;  %s1305_s19 = sshll.u32 %s289_s15, 1 }
  0x28   : > { %2416 = sst [smem:[#allocation24_spill]] %s2415_s14  ;;  %s298_s17 = scalar_lea.hbm %s2387_s0, %s1306_s16 }
  0x29   : > { %s300_s18 = sshll.u32 %s298_s17, 4  ;;  %s293_s2 = scalar_lea.vmem [#allocation3], %s1305_s19  ;;  %s301_s18 = int_to_ptr.hbm [resolvable:$true] %s300_s18 }
  0x2a   : > { %s302_s4 = sshll.u32 %s293_s2, 4  ;;  %p1621_p8 = pnand %p1636_p7, %p2057_p10  ;;  %s303_s4 = int_to_ptr.vmem [resolvable:$true] %s302_s4 }
  0x2b   : > { %s1307_s21 = sshll.u32 %s289_s15, 7  ;;  %s1452_s23 = sshll.u32 %s1939_s28, 7 }
  0x2c   : > { %s313_s22 = scalar_lea.vmem [#allocation6], %s1307_s21  ;;  %s290_s14 = scalar_lea.sflag [#allocation4], %s289_s15 }
  0x2d   : > { %s322_s13 = sshll.u32 %s313_s22, 4  ;;  %s309_s26 = sand.u32 1, %s1943_s29   ;;  %s323_s13 = int_to_ptr.vmem [resolvable:$true] %s322_s13 }
  0x2e   : > { %1623 = dma.hbm_to_vmem [thread:$0]  (!%p1621_p8), %s301_s18, 32, %s303_s4, %s290_s14  }
  0x2f   : > { %s319_s20 = scalar_lea.hbm %s2388_s1, %s1452_s23  ;;  %s310_s17 = scalar_lea.sflag [#allocation7], %s309_s26 }
  0x30   : > { %s320_s16 = sshll.u32 %s319_s20, 4  ;;  %s2417_s2 = smov 4   ;;  %s321_s16 = int_to_ptr.hbm [resolvable:$true] %s320_s16 }
  0x31   : > { %s2418_s19 = smov 64   ;;  %334 = sbr.rel (%p2031_p3) target bundleno = 666 (0x29a), region = 44 }
  0x32   : > { %1626 = dma.hbm_to_vmem [thread:$0]  (!%p1621_p8), %s321_s16, 2048, %s323_s13, %s310_s17, %s2418_s19, %s2418_s19, %s2417_s2  }
  0x33   : > { %s2102_s22 = sand.u32 (!%p2031_p3), 1, %s1927_s25  }
  0x34   : > { %s1311_s4 = sshll.u32 (!%p2031_p3), %s2102_s22, 1  ;;  %s337_s7 = scalar_lea.sflag (!%p2031_p3), [#allocation4], %s2102_s22 }
  0x35   : > { %s2108_s24 = scalar_lea.vmem (!%p2031_p3), [#allocation3], %s1311_s4 }
  0x36   : > { %1898 = dma.done.wait (%p2068_p0), %s337_s7, 32  }
  0x37   : > { %1900 = vsyncadd (%p2068_p0), %s337_s7, 4294967264  ;;  %s346_s26 = sand.u32 1, %s2023_s30   ;;  %s1312_s11 = sshll.u32 %s2102_s22, 7 }
  0x38   : > { %s347_s18 = scalar_lea.sflag [#allocation7], %s346_s26  ;;  %s2118_s8 = scalar_lea.vmem [#allocation6], %s1312_s11 }
  0x39   : > { %1902 = dma.done.wait (%p2068_p0), %s347_s18, 2048  }
  0x3a   : > { %1904 = vsyncadd (%p2068_p0), %s347_s18, 4294965248 }
  0x3b   : > { %1906 = dma.done.wait (%p66_p1), [#allocation7], 1024  }
  0x3c   : > { %1908 = vsyncadd (%p66_p1), [#allocation7], 4294966272 }
  0x3d   : > { %1910 = dma.done.wait (%p66_p1), [#allocation10], 1024  }
  0x3e   : > { %1912 = vsyncadd (%p66_p1), [#allocation10], 4294966272  ;;  %v1476_v0 = vld [vmem:[#allocation8 + $0x38] sm:$0xff]  ;;  %v1475_v1 = vld [vmem:[#allocation8 + $0x30] sm:$0xff]  ;;  %s2196_s15 = scalar_lea.vmem [#allocation11], %s1312_s11  ;;  %s1485_s9 = sshll.u32 %s1935_s27, 7 }
  0x3f   : > { %609 = vmatpush.bf16.msra.mxu0 %v1476_v0  ;;  %1581 = vmatpush.bf16.msra.mxu2 %v1476_v0  ;;  %v1474_v2 = vld [vmem:[#allocation8 + $0x28] sm:$0xff]  ;;  %v1473_v3 = vld [vmem:[#allocation8 + $0x20] sm:$0xff]  ;;  %v1472_v4 = vld [vmem:[#allocation8 + $0x18] sm:$0xff]  ;;  %s1122_s20 = scalar_lea.hbm %s2393_s6, %s1485_s9  ;;  %s1123_s16 = sshll.u32 %s2196_s15, 4  ;;  %s1124_s16 = int_to_ptr.vmem [resolvable:$true] %s1123_s16 }
  0x40   : > { %v1471_v5 = vld [vmem:[#allocation8 + $0x10] sm:$0xff]  ;;  %v1470_v6 = vld [vmem:[#allocation8 + $0x8] sm:$0xff]  ;;  %v1469_v7 = vld [vmem:[#allocation8] sm:$0xff]  ;;  %s1125_s17 = sshll.u32 %s1122_s20, 4  ;;  %s1105_s2 = scalar_lea.sflag [#allocation5], %s2102_s22  ;;  %s1126_s17 = int_to_ptr.hbm [resolvable:$true] %s1125_s17 }
  0x41   : > { %v1453_v8 = vld [vmem:[%s2118_s8] sm:$0xff]  ;;  %v1462_v9 = vld [vmem:[%s2118_s8 + $0x48] sm:$0xff]  ;;  %v1463_v11 = vld [vmem:[%s2118_s8 + $0x50] sm:$0xff]  ;;  %s1831_s19 = sshra.s32 %s1126_s17, 4  ;;  %s1837_s11 = scalar_lea.hbm %s2393_s6, 256  ;;  %s1832_s19 = int_to_ptr.hbm [resolvable:$true] %s1831_s19 }
  0x42   : > { %v1454_v10 = vld [vmem:[%s2118_s8 + $0x8] sm:$0xff]  ;;  %v1455_v12 = vld [vmem:[%s2118_s8 + $0x10] sm:$0xff]  ;;  %v1464_v13 = vld [vmem:[%s2118_s8 + $0x58] sm:$0xff]  ;;  %s1833_s7 = scalar_lea.hbm %s1832_s19, 128  ;;  %p1838_p10 = scmp.lt.s32.totalorder %s1832_s19, %s2393_s6 }
  0x43   : > { %610 = vmatpush.bf16.msra.mxu0 %v1475_v1  ;;  %1582 = vmatpush.bf16.msra.mxu2 %v1475_v1  ;;  %v1456_v14 = vld [vmem:[%s2118_s8 + $0x18] sm:$0xff]  ;;  %v1465_v15 = vld [vmem:[%s2118_s8 + $0x60] sm:$0xff]  ;;  %v1466_v17 = vld [vmem:[%s2118_s8 + $0x68] sm:$0xff]  ;;  %p1834_p1 = scmp.ne.s32.totalorder %s1832_s19, %s1833_s7  ;;  %p1839_p11 = scmp.lt.s32.totalorder %s1837_s11, %s1833_s7 }
  0x44   : > { %v1457_v16 = vld [vmem:[%s2118_s8 + $0x20] sm:$0xff]  ;;  %v1484_v18 = vld [vmem:[#allocation9 + $0x38] sm:$0xff]  ;;  %v1458_v19 = vld [vmem:[%s2118_s8 + $0x28] sm:$0xff] }
  0x45   : > { %814 = vmatpush.bf16.msra.mxu1 %v1484_v18  ;;  %1589 = vmatpush.bf16.msra.mxu3 %v1484_v18  ;;  %v1467_v20 = vld [vmem:[%s2118_s8 + $0x70] sm:$0xff]  ;;  %v1482_v22 = vld [vmem:[#allocation9 + $0x28] sm:$0xff]  ;;  %v1481_v23 = vld [vmem:[#allocation9 + $0x20] sm:$0xff]  ;;  %p1835_p3 = pnand %p1834_p1, %p2072_p2  ;;  %p1840_p12 = por %p1839_p11, %p1838_p10 }
  0x46   : > { %v1483_v21 = vld [vmem:[#allocation9 + $0x30] sm:$0xff]  ;;  %v1480_v24 = vld [vmem:[#allocation9 + $0x18] sm:$0xff]  ;;  %v1478_v28 = vld [vmem:[#allocation9 + $0x8] sm:$0xff] }
  0x47   : > { %611 = vmatpush.bf16.msra.mxu0 %v1474_v2  ;;  %1583 = vmatpush.bf16.msra.mxu2 %v1474_v2  ;;  %v1459_v25 = vld [vmem:[%s2118_s8 + $0x30] sm:$0xff]  ;;  %v1468_v26 = vld [vmem:[%s2118_s8 + $0x78] sm:$0xff]  ;;  %v1477_v29 = vld [vmem:[#allocation9] sm:$0xff]  ;;  %p1836_p9 = pneg %p1835_p3 }
  0x48   : > { %v1479_v27 = vld [vmem:[#allocation9 + $0x10] sm:$0xff]  ;;  %v1460_v30 = vld [vmem:[%s2118_s8 + $0x38] sm:$0xff]  ;;  %v1461_v31 = vld [vmem:[%s2118_s8 + $0x40] sm:$0xff] }
  0x49   : > { %815 = vmatpush.bf16.msra.mxu1 %v1483_v21  ;;  %1590 = vmatpush.bf16.msra.mxu3 %v1483_v21  ;;  %v2151_v33 = vld [vmem:[%s2390_s3] ss:$0 sm:$0xff]  ;;  %p1841_p13 = pnand %p1840_p12, %p1836_p9 }
  0x4b   : > { %612 = vmatpush.bf16.msra.mxu0 %v1473_v3  ;;  %1584 = vmatpush.bf16.msra.mxu2 %v1473_v3 }
  0x4d   : > { %816 = vmatpush.bf16.msra.mxu1 %v1482_v22  ;;  %1591 = vmatpush.bf16.msra.mxu3 %v1482_v22 }
  0x4f   : > { %613 = vmatpush.bf16.msra.mxu0 %v1472_v4  ;;  %1585 = vmatpush.bf16.msra.mxu2 %v1472_v4 }
  0x51   : > { %817 = vmatpush.bf16.msra.mxu1 %v1481_v23  ;;  %1592 = vmatpush.bf16.msra.mxu3 %v1481_v23 }
  0x53   : > { %614 = vmatpush.bf16.msra.mxu0 %v1471_v5  ;;  %1586 = vmatpush.bf16.msra.mxu2 %v1471_v5 }
  0x55   : > { %818 = vmatpush.bf16.msra.mxu1 %v1480_v24  ;;  %1593 = vmatpush.bf16.msra.mxu3 %v1480_v24 }
  0x57   : > { %615 = vmatpush.bf16.msra.mxu0 %v1470_v6  ;;  %1587 = vmatpush.bf16.msra.mxu2 %v1470_v6 }
  0x59   : > { %819 = vmatpush.bf16.msra.mxu1 %v1479_v27  ;;  %1594 = vmatpush.bf16.msra.mxu3 %v1479_v27 }
  0x5b   : > { %616 = vmatpush.bf16.msra.mxu0 %v1469_v7  ;;  %1588 = vmatpush.bf16.msra.mxu2 %v1469_v7 }
  0x5d   : > { %820 = vmatpush.bf16.msra.mxu1 %v1478_v28  ;;  %1595 = vmatpush.bf16.msra.mxu3 %v1478_v28 }
  0x5e   : > { %617 = vmatmul.bf16.vlgmr.msra.gmra.mxu0 %v1453_v8  ;;  %662 = vmatmul.bf16.vlgmr.msra.gmra.mxu2 %v1462_v9 }
  0x61   : > { %821 = vmatpush.bf16.msra.mxu1 %v1477_v29  ;;  %1596 = vmatpush.bf16.msra.mxu3 %v1477_v29 }
  0x6e   : > { %622 = vmatmul.bf16.gmra.mxu0 %v1454_v10  ;;  %667 = vmatmul.bf16.gmra.mxu2 %v1463_v11 }
  0x7e   : > { %627 = vmatmul.bf16.gmra.mxu0 %v1455_v12  ;;  %672 = vmatmul.bf16.gmra.mxu2 %v1464_v13 }
  0x8e   : > { %632 = vmatmul.bf16.gmra.mxu0 %v1456_v14  ;;  %677 = vmatmul.bf16.gmra.mxu2 %v1465_v15 }
  0x9e   : > { %637 = vmatmul.bf16.gmra.mxu0 %v1457_v16  ;;  %682 = vmatmul.bf16.gmra.mxu2 %v1466_v17 }
  0xae   : > { %642 = vmatmul.bf16.gmra.mxu0 %v1458_v19  ;;  %687 = vmatmul.bf16.gmra.mxu2 %v1467_v20 }
  0xbe   : > { %647 = vmatmul.bf16.gmra.mxu0 %v1459_v25  ;;  %692 = vmatmul.bf16.gmra.mxu2 %v1468_v26 }
  0xce   : > { %652 = vmatmul.bf16.gmra.mxu0 %v1460_v30 }
  0xdb   : > { %v618_v32 = vpop.f32.mrf.mxu0 }
  0xdc   : > { %v619_v35 = vadd.f32 %v2151_v33, %v618_v32 }
  0xde   : > { %657 = vmatmul.bf16.gmra.mxu0 %v1461_v31  ;;  %v698_v38 = vmax.f32 %v619_v35, 0.0 }
  0xe1   : > { %v663_v34 = vpop.f32.mrf.mxu2 }
  0xe2   : > { %v664_v40 = vadd.f32 %v2151_v33, %v663_v34 }
  0xe3   : > { %v620_v36 = vpop.f32.mrf.mxu0 }
  0xe4   : > { %v621_v37 = vadd.f32 %v2151_v33, %v620_v36  ;;  %v716_v45 = vmax.f32 %v664_v40, 0.0 }
  0xe6   : > { %v699_v39 = vmax.f32 %v621_v37, 0.0 }
  0xe8   : > { %v730_v41 = vpack.c.bf16 %v699_v39, %v698_v38 }
  0xe9   : > { %v665_v42 = vpop.f32.mrf.mxu2 }
  0xea   : > { %v666_v43 = vadd.f32 %v2151_v33, %v665_v42  ;;  %822 = vmatmul.bf16.vlgmr.msra.gmra.mxu1 %v730_v41 }
  0xeb   : > { %v623_v44 = vpop.f32.mrf.mxu0 }
  0xec   : > { %v717_v46 = vmax.f32 %v666_v43, 0.0  ;;  %v624_v49 = vadd.f32 %v2151_v33, %v623_v44 }
  0xee   : > { %v739_v47 = vpack.c.bf16 %v717_v46, %v716_v45  ;;  %v700_v52 = vmax.f32 %v624_v49, 0.0 }
  0xf0   : > { %867 = vmatmul.bf16.vlgmr.msra.gmra.mxu3 %v739_v47 }
  0xf1   : > { %v668_v48 = vpop.f32.mrf.mxu2 }
  0xf2   : > { %v669_v54 = vadd.f32 %v2151_v33, %v668_v48 }
  0xf3   : > { %v625_v50 = vpop.f32.mrf.mxu0 }
  0xf4   : > { %v626_v51 = vadd.f32 %v2151_v33, %v625_v50  ;;  %v718_v59 = vmax.f32 %v669_v54, 0.0 }
  0xf6   : > { %v701_v53 = vmax.f32 %v626_v51, 0.0 }
  0xf8   : > { %v731_v55 = vpack.c.bf16 %v701_v53, %v700_v52 }
  0xf9   : > { %v670_v56 = vpop.f32.mrf.mxu2 }
  0xfa   : > { %v671_v57 = vadd.f32 %v2151_v33, %v670_v56  ;;  %827 = vmatmul.bf16.gmra.mxu1 %v731_v55 }
  0xfb   : > { %v628_v58 = vpop.f32.mrf.mxu0 }
  0xfc   : > { %v719_v60 = vmax.f32 %v671_v57, 0.0  ;;  %v629_v63 = vadd.f32 %v2151_v33, %v628_v58 }
  0xfe   : > { %v740_v61 = vpack.c.bf16 %v719_v60, %v718_v59  ;;  %v702_v2 = vmax.f32 %v629_v63, 0.0 }
 0x100   : > { %872 = vmatmul.bf16.gmra.mxu3 %v740_v61 }
 0x101   : > { %v673_v62 = vpop.f32.mrf.mxu2 }
 0x102   : > { %v674_v4 = vadd.f32 %v2151_v33, %v673_v62 }
 0x103   : > { %v630_v0 = vpop.f32.mrf.mxu0 }
 0x104   : > { %v631_v1 = vadd.f32 %v2151_v33, %v630_v0  ;;  %v720_v9 = vmax.f32 %v674_v4, 0.0 }
 0x106   : > { %v703_v3 = vmax.f32 %v631_v1, 0.0 }
 0x108   : > { %v732_v5 = vpack.c.bf16 %v703_v3, %v702_v2 }
 0x109   : > { %v675_v6 = vpop.f32.mrf.mxu2 }
 0x10a   : > { %v676_v7 = vadd.f32 %v2151_v33, %v675_v6  ;;  %832 = vmatmul.bf16.gmra.mxu1 %v732_v5 }
 0x10b   : > { %v633_v8 = vpop.f32.mrf.mxu0 }
 0x10c   : > { %v721_v10 = vmax.f32 %v676_v7, 0.0  ;;  %v634_v13 = vadd.f32 %v2151_v33, %v633_v8 }
 0x10e   : > { %v741_v11 = vpack.c.bf16 %v721_v10, %v720_v9  ;;  %v704_v16 = vmax.f32 %v634_v13, 0.0 }
 0x110   : > { %877 = vmatmul.bf16.gmra.mxu3 %v741_v11 }
 0x111   : > { %v678_v12 = vpop.f32.mrf.mxu2 }
 0x112   : > { %v679_v18 = vadd.f32 %v2151_v33, %v678_v12 }
 0x113   : > { %v635_v14 = vpop.f32.mrf.mxu0 }
 0x114   : > { %v636_v15 = vadd.f32 %v2151_v33, %v635_v14  ;;  %v722_v23 = vmax.f32 %v679_v18, 0.0  ;;  %v2188_v18 = vld [vmem:[%s2392_s5] ss:$0 sm:$0xff] }
 0x116   : > { %v705_v17 = vmax.f32 %v636_v15, 0.0 }
 0x118   : > { %v733_v19 = vpack.c.bf16 %v705_v17, %v704_v16 }
 0x119   : > { %v680_v20 = vpop.f32.mrf.mxu2 }
 0x11a   : > { %v681_v21 = vadd.f32 %v2151_v33, %v680_v20  ;;  %837 = vmatmul.bf16.gmra.mxu1 %v733_v19 }
 0x11b   : > { %v638_v22 = vpop.f32.mrf.mxu0 }
 0x11c   : > { %v723_v24 = vmax.f32 %v681_v21, 0.0  ;;  %v639_v27 = vadd.f32 %v2151_v33, %v638_v22 }
 0x11e   : > { %v742_v25 = vpack.c.bf16 %v723_v24, %v722_v23  ;;  %v706_v30 = vmax.f32 %v639_v27, 0.0 }
 0x120   : > { %882 = vmatmul.bf16.gmra.mxu3 %v742_v25 }
 0x121   : > { %v683_v26 = vpop.f32.mrf.mxu2 }
 0x122   : > { %v684_v32 = vadd.f32 %v2151_v33, %v683_v26 }
 0x123   : > { %v640_v28 = vpop.f32.mrf.mxu0 }
 0x124   : > { %v641_v29 = vadd.f32 %v2151_v33, %v640_v28  ;;  %v724_v38 = vmax.f32 %v684_v32, 0.0 }
 0x126   : > { %v707_v31 = vmax.f32 %v641_v29, 0.0 }
 0x128   : > { %v734_v34 = vpack.c.bf16 %v707_v31, %v706_v30 }
 0x129   : > { %v685_v35 = vpop.f32.mrf.mxu2 }
 0x12a   : > { %v686_v36 = vadd.f32 %v2151_v33, %v685_v35  ;;  %842 = vmatmul.bf16.gmra.mxu1 %v734_v34 }
 0x12b   : > { %v643_v37 = vpop.f32.mrf.mxu0 }
 0x12c   : > { %v725_v39 = vmax.f32 %v686_v36, 0.0  ;;  %v644_v42 = vadd.f32 %v2151_v33, %v643_v37 }
 0x12e   : > { %v743_v40 = vpack.c.bf16 %v725_v39, %v724_v38  ;;  %v708_v45 = vmax.f32 %v644_v42, 0.0 }
 0x130   : > { %887 = vmatmul.bf16.gmra.mxu3 %v743_v40 }
 0x131   : > { %v688_v41 = vpop.f32.mrf.mxu2 }
 0x132   : > { %v689_v47 = vadd.f32 %v2151_v33, %v688_v41 }
 0x133   : > { %v645_v43 = vpop.f32.mrf.mxu0 }
 0x134   : > { %v646_v44 = vadd.f32 %v2151_v33, %v645_v43  ;;  %v726_v52 = vmax.f32 %v689_v47, 0.0 }
 0x136   : > { %v709_v46 = vmax.f32 %v646_v44, 0.0 }
 0x138   : > { %v735_v48 = vpack.c.bf16 %v709_v46, %v708_v45 }
 0x139   : > { %v690_v49 = vpop.f32.mrf.mxu2 }
 0x13a   : > { %v691_v50 = vadd.f32 %v2151_v33, %v690_v49  ;;  %847 = vmatmul.bf16.gmra.mxu1 %v735_v48 }
 0x13b   : > { %v648_v51 = vpop.f32.mrf.mxu0 }
 0x13c   : > { %v727_v53 = vmax.f32 %v691_v50, 0.0  ;;  %v649_v56 = vadd.f32 %v2151_v33, %v648_v51 }
 0x13e   : > { %v744_v54 = vpack.c.bf16 %v727_v53, %v726_v52  ;;  %v710_v59 = vmax.f32 %v649_v56, 0.0 }
 0x140   : > { %892 = vmatmul.bf16.gmra.mxu3 %v744_v54 }
 0x141   : > { %v693_v55 = vpop.f32.mrf.mxu2 }
 0x142   : > { %v694_v61 = vadd.f32 %v2151_v33, %v693_v55 }
 0x143   : > { %v650_v57 = vpop.f32.mrf.mxu0 }
 0x144   : > { %v651_v58 = vadd.f32 %v2151_v33, %v650_v57  ;;  %v728_v2 = vmax.f32 %v694_v61, 0.0 }
 0x146   : > { %v711_v60 = vmax.f32 %v651_v58, 0.0 }
 0x148   : > { %v736_v62 = vpack.c.bf16 %v711_v60, %v710_v59 }
 0x149   : > { %v695_v63 = vpop.f32.mrf.mxu2 }
 0x14a   : > { %v696_v0 = vadd.f32 %v2151_v33, %v695_v63  ;;  %852 = vmatmul.bf16.gmra.mxu1 %v736_v62 }
 0x14b   : > { %v653_v1 = vpop.f32.mrf.mxu0 }
 0x14c   : > { %v729_v3 = vmax.f32 %v696_v0, 0.0  ;;  %v654_v5 = vadd.f32 %v2151_v33, %v653_v1 }
 0x14e   : > { %v745_v4 = vpack.c.bf16 %v729_v3, %v728_v2  ;;  %v712_v8 = vmax.f32 %v654_v5, 0.0 }
 0x150   : > { %897 = vmatmul.bf16.gmra.mxu3 %v745_v4 }
 0x153   : > { %v655_v6 = vpop.f32.mrf.mxu0 }
 0x154   : > { %v656_v7 = vadd.f32 %v2151_v33, %v655_v6 }
 0x156   : > { %v713_v9 = vmax.f32 %v656_v7, 0.0 }
 0x158   : > { %v737_v10 = vpack.c.bf16 %v713_v9, %v712_v8 }
 0x15a   : > { %857 = vmatmul.bf16.gmra.mxu1 %v737_v10 }
 0x15b   : > { %v658_v11 = vpop.f32.mrf.mxu0 }
 0x15c   : > { %v659_v12 = vadd.f32 %v2151_v33, %v658_v11 }
 0x15e   : > { %v714_v14 = vmax.f32 %v659_v12, 0.0 }
 0x163   : > { %v660_v13 = vpop.f32.mrf.mxu0 }
 0x164   : > { %v661_v15 = vadd.f32 %v2151_v33, %v660_v13 }
 0x166   : > { %v715_v16 = vmax.f32 %v661_v15, 0.0 }
 0x167   : > { %v823_v17 = vpop.f32.mrf.mxu1 }
 0x168   : > { %v738_v19 = vpack.c.bf16 %v715_v16, %v714_v14  ;;  %v824_v20 = vadd.f32 %v2188_v18, %v823_v17 }
 0x16a   : > { %862 = vmatmul.bf16.gmra.mxu1 %v738_v19  ;;  %v903_v22 = vpack.c.bf16 %v824_v20, %v824_v20 }
 0x16c   : > { %v2192_v27 = vunpack.c.l.b16 %v903_v22 }
 0x16f   : > { %v825_v21 = vpop.f32.mrf.mxu1 }
 0x170   : > { %v826_v23 = vadd.f32 %v2188_v18, %v825_v21 }
 0x172   : > { %v904_v24 = vpack.c.bf16 %v826_v23, %v826_v23  ;;  %v1489_v25 = vpack.c.bf16 %v826_v23, %v824_v20 }
 0x173   : > { %v868_v26 = vpop.f32.mrf.mxu3 }
 0x174   : > { %1490 = vst [vmem:[%s2196_s15] sm:$0xff] %v1489_v25   ;;  %v2199_v33 = vunpack.c.l.b16 %v904_v24  ;;  %v869_v30 = vadd.f32 %v2188_v18, %v868_v26 }
 0x176   : > { %v1039_v28 = vpack.c.b16 %v2199_v33, %v2192_v27  ;;  %v921_v32 = vpack.c.bf16 %v869_v30, %v869_v30 }
 0x177   : > { %v828_v29 = vpop.f32.mrf.mxu1 }
 0x178   : > { %v829_v34 = vadd.f32 %v2188_v18, %v828_v29  ;;  %v2206_v39 = vunpack.c.l.b16 %v921_v32 }
 0x17a   : > { %v905_v40 = vpack.c.bf16 %v829_v34, %v829_v34 }
 0x17b   : > { %v870_v31 = vpop.f32.mrf.mxu3 }
 0x17c   : > { %v871_v35 = vadd.f32 %v2188_v18, %v870_v31  ;;  %v2214_v47 = vunpack.c.l.b16 %v905_v40 }
 0x17e   : > { %v922_v36 = vpack.c.bf16 %v871_v35, %v871_v35  ;;  %v1534_v37 = vpack.c.bf16 %v871_v35, %v869_v30 }
 0x17f   : > { %v830_v38 = vpop.f32.mrf.mxu1 }
 0x180   : > { %1574 = vst [vmem:[%s2196_s15 + $0x48] sm:$0xff] %v1534_v37   ;;  %v2209_v41 = vunpack.c.l.b16 %v922_v36  ;;  %v831_v42 = vadd.f32 %v2188_v18, %v830_v38 }
 0x182   : > { %v906_v43 = vpack.c.bf16 %v831_v42, %v831_v42  ;;  %v1494_v44 = vpack.c.bf16 %v831_v42, %v829_v34  ;;  %v1048_v45 = vpack.c.b16 %v2209_v41, %v2206_v39 }
 0x183   : > { %v873_v46 = vpop.f32.mrf.mxu3 }
 0x184   : > { %1566 = vst [vmem:[%s2196_s15 + $0x8] sm:$0xff] %v1494_v44   ;;  %v2217_v48 = vunpack.c.l.b16 %v906_v43  ;;  %v874_v51 = vadd.f32 %v2188_v18, %v873_v46 }
 0x186   : > { %v1040_v49 = vpack.c.b16 %v2217_v48, %v2214_v47  ;;  %v923_v53 = vpack.c.bf16 %v874_v51, %v874_v51 }
 0x187   : > { %v833_v50 = vpop.f32.mrf.mxu1 }
 0x188   : > { %v834_v54 = vadd.f32 %v2188_v18, %v833_v50  ;;  %v2224_v59 = vunpack.c.l.b16 %v923_v53 }
 0x18a   : > { %v907_v60 = vpack.c.bf16 %v834_v54, %v834_v54 }
 0x18b   : > { %v875_v52 = vpop.f32.mrf.mxu3 }
 0x18c   : > { %v876_v55 = vadd.f32 %v2188_v18, %v875_v52  ;;  %v2232_v3 = vunpack.c.l.b16 %v907_v60 }
 0x18e   : > { %v924_v56 = vpack.c.bf16 %v876_v55, %v876_v55  ;;  %v1539_v57 = vpack.c.bf16 %v876_v55, %v874_v51 }
 0x18f   : > { %v835_v58 = vpop.f32.mrf.mxu1 }
 0x190   : > { %1575 = vst [vmem:[%s2196_s15 + $0x50] sm:$0xff] %v1539_v57   ;;  %v2227_v61 = vunpack.c.l.b16 %v924_v56  ;;  %v836_v62 = vadd.f32 %v2188_v18, %v835_v58 }
 0x192   : > { %v908_v63 = vpack.c.bf16 %v836_v62, %v836_v62  ;;  %v1499_v0 = vpack.c.bf16 %v836_v62, %v834_v54  ;;  %v1049_v1 = vpack.c.b16 %v2227_v61, %v2224_v59 }
 0x193   : > { %v878_v2 = vpop.f32.mrf.mxu3 }
 0x194   : > { %1567 = vst [vmem:[%s2196_s15 + $0x10] sm:$0xff] %v1499_v0   ;;  %v2235_v4 = vunpack.c.l.b16 %v908_v63  ;;  %v879_v7 = vadd.f32 %v2188_v18, %v878_v2 }
 0x196   : > { %v1041_v5 = vpack.c.b16 %v2235_v4, %v2232_v3  ;;  %v925_v9 = vpack.c.bf16 %v879_v7, %v879_v7 }
 0x197   : > { %v838_v6 = vpop.f32.mrf.mxu1 }
 0x198   : > { %v839_v10 = vadd.f32 %v2188_v18, %v838_v6  ;;  %v2242_v15 = vunpack.c.l.b16 %v925_v9 }
 0x19a   : > { %v909_v16 = vpack.c.bf16 %v839_v10, %v839_v10 }
 0x19b   : > { %v880_v8 = vpop.f32.mrf.mxu3 }
 0x19c   : > { %v881_v11 = vadd.f32 %v2188_v18, %v880_v8  ;;  %v2250_v24 = vunpack.c.l.b16 %v909_v16 }
 0x19e   : > { %v926_v12 = vpack.c.bf16 %v881_v11, %v881_v11  ;;  %v1544_v13 = vpack.c.bf16 %v881_v11, %v879_v7 }
 0x19f   : > { %v840_v14 = vpop.f32.mrf.mxu1 }
 0x1a0   : > { %1576 = vst [vmem:[%s2196_s15 + $0x58] sm:$0xff] %v1544_v13   ;;  %v2245_v17 = vunpack.c.l.b16 %v926_v12  ;;  %v841_v19 = vadd.f32 %v2188_v18, %v840_v14 }
 0x1a2   : > { %v910_v20 = vpack.c.bf16 %v841_v19, %v841_v19  ;;  %v1504_v21 = vpack.c.bf16 %v841_v19, %v839_v10  ;;  %v1050_v22 = vpack.c.b16 %v2245_v17, %v2242_v15  ;;  %v968_v10 = vld [vmem:[%s2108_s24] sm:$0x3] }
 0x1a3   : > { %v883_v23 = vpop.f32.mrf.mxu3  ;;  %970 = vst [vmem:[#allocation1] ss:$9 sm:$0xff] %v968_v10 }
 0x1a4   : > { %1568 = vst [vmem:[%s2196_s15 + $0x18] sm:$0xff] %v1504_v21   ;;  %v2253_v25 = vunpack.c.l.b16 %v910_v20  ;;  %v2258_v31 = vadd.f32 %v2188_v18, %v883_v23 }
 0x1a6   : > { %v1042_v26 = vpack.c.b16 %v2253_v25, %v2250_v24 }
 0x1a7   : > { %v843_v29 = vpop.f32.mrf.mxu1 }
 0x1a8   : > { %v2266_v36 = vadd.f32 %v2188_v18, %v843_v29 }
 0x1aa   : > { %v972_v59 = vld [vmem:[#allocation1 + $0x9] sm:$0xff]  ;;  %v971_v61 = vld [vmem:[#allocation1] sm:$0xff] }
 0x1ab   : > { %v885_v30 = vpop.f32.mrf.mxu3 }
 0x1ac   : > { %v2261_v32 = vadd.f32 %v2188_v18, %v885_v30 }
 0x1ae   : > { %v1549_v34 = vpack.c.bf16 %v2261_v32, %v2258_v31 }
 0x1af   : > { %v845_v35 = vpop.f32.mrf.mxu1 }
 0x1b0   : > { %1577 = vst [vmem:[%s2196_s15 + $0x60] sm:$0xff] %v1549_v34   ;;  %v2270_v37 = vadd.f32 %v2188_v18, %v845_v35 }
 0x1b2   : > { %v1509_v38 = vpack.c.bf16 %v2270_v37, %v2266_v36 }
 0x1b3   : > { %v888_v40 = vpop.f32.mrf.mxu3 }
 0x1b4   : > { %1569 = vst [vmem:[%s2196_s15 + $0x20] sm:$0xff] %v1509_v38   ;;  %v889_v44 = vadd.f32 %v2188_v18, %v888_v40 }
 0x1b7   : > { %v848_v42 = vpop.f32.mrf.mxu1 }
 0x1b8   : > { %v2278_v52 = vadd.f32 %v2188_v18, %v848_v42 }
 0x1bb   : > { %v890_v43 = vpop.f32.mrf.mxu3 }
 0x1bc   : > { %v891_v46 = vadd.f32 %v2188_v18, %v890_v43 }
 0x1be   : > { %v1554_v50 = vpack.c.bf16 %v891_v46, %v889_v44  ;;  %v930_v38 = vpack.c.bf16 %v891_v46, %v891_v46 }
 0x1bf   : > { %v850_v51 = vpop.f32.mrf.mxu1 }
 0x1c0   : > { %1578 = vst [vmem:[%s2196_s15 + $0x68] sm:$0xff] %v1554_v50   ;;  %v851_v53 = vadd.f32 %v2188_v18, %v850_v51 }
 0x1c2   : > { %v1514_v54 = vpack.c.bf16 %v851_v53, %v2278_v52 }
 0x1c3   : > { %v893_v55 = vpop.f32.mrf.mxu3 }
 0x1c4   : > { %1570 = vst [vmem:[%s2196_s15 + $0x28] sm:$0xff] %v1514_v54   ;;  %v894_v58 = vadd.f32 %v2188_v18, %v893_v55  ;;  %v929_v54 = vpack.c.bf16 %v889_v44, %v889_v44  ;;  %v913_v44 = vpack.c.bf16 %v2278_v52, %v2278_v52 }
 0x1c6   : > { %v931_v21 = vpack.c.bf16 %v894_v58, %v894_v58 }
 0x1c7   : > { %v853_v56 = vpop.f32.mrf.mxu1 }
 0x1c8   : > { %v854_v0 = vadd.f32 %v2188_v18, %v853_v56  ;;  %v1035_v55 = vunpack.c.l.b16 %v931_v21 }
 0x1ca   : > { %v915_v56 = vpack.c.bf16 %v854_v0, %v854_v0 }
 0x1cb   : > { %v895_v57 = vpop.f32.mrf.mxu3 }
 0x1cc   : > { %v896_v60 = vadd.f32 %v2188_v18, %v895_v57 }
 0x1ce   : > { %v1559_v62 = vpack.c.bf16 %v896_v60, %v894_v58  ;;  %v932_v16 = vpack.c.bf16 %v896_v60, %v896_v60  ;;  %v928_v60 = vpack.c.bf16 %v2261_v32, %v2261_v32  ;;  %v912_v32 = vpack.c.bf16 %v2270_v37, %v2270_v37 }
 0x1cf   : > { %v855_v63 = vpop.f32.mrf.mxu1 }
 0x1d0   : > { %1579 = vst [vmem:[%s2196_s15 + $0x70] sm:$0xff] %v1559_v62   ;;  %v856_v2 = vadd.f32 %v2188_v18, %v855_v63  ;;  %v1036_v40 = vunpack.c.l.b16 %v932_v16  ;;  %v1034_v62 = vunpack.c.l.b16 %v930_v38  ;;  %v914_v63 = vpack.c.bf16 %v851_v53, %v851_v53 }
 0x1d1   : > { %v1032_v10 = vunpack.c.l.b16 %v928_v60  ;;  %v1017_v16 = vunpack.c.l.b16 %v913_v44 }
 0x1d2   : > { %v1519_v6 = vpack.c.bf16 %v856_v2, %v854_v0  ;;  %v916_v42 = vpack.c.bf16 %v856_v2, %v856_v2  ;;  %v1053_v46 = vpack.c.b16 %v1036_v40, %v1035_v55  ;;  %v927_v2 = vpack.c.bf16 %v2258_v31, %v2258_v31 }
 0x1d3   : > { %v898_v7 = vpop.f32.mrf.mxu3  ;;  %v1019_v0 = vunpack.c.l.b16 %v915_v56  ;;  %v1016_v31 = vunpack.c.l.b16 %v912_v32 }
 0x1d4   : > { %1571 = vst [vmem:[%s2196_s15 + $0x30] sm:$0xff] %v1519_v6   ;;  %v899_v9 = vadd.f32 %v2188_v18, %v898_v7  ;;  %v1020_v6 = vunpack.c.l.b16 %v916_v42 }
 0x1d6   : > { %v933_v12 = vpack.c.bf16 %v899_v9, %v899_v9  ;;  %v1045_v53 = vpack.c.b16 %v1020_v6, %v1019_v0 }
 0x1d7   : > { %v858_v8 = vpop.f32.mrf.mxu1 }
 0x1d8   : > { %v859_v13 = vadd.f32 %v2188_v18, %v858_v8  ;;  %v1037_v29 = vunpack.c.l.b16 %v933_v12 }
 0x1da   : > { %v917_v30 = vpack.c.bf16 %v859_v13, %v859_v13 }
 0x1db   : > { %v900_v11 = vpop.f32.mrf.mxu3 }
 0x1dc   : > { %v901_v14 = vadd.f32 %v2188_v18, %v900_v11  ;;  %v1021_v57 = vunpack.c.l.b16 %v917_v30  ;;  %v1018_v11 = vunpack.c.l.b16 %v914_v63 }
 0x1de   : > { %v934_v19 = vpack.c.bf16 %v901_v14, %v901_v14  ;;  %v1564_v20 = vpack.c.bf16 %v901_v14, %v899_v9  ;;  %v1033_v9 = vunpack.c.l.b16 %v929_v54  ;;  %v911_v14 = vpack.c.bf16 %v2266_v36, %v2266_v36 }
 0x1df   : > { %v860_v23 = vpop.f32.mrf.mxu1  ;;  %v1044_v52 = vpack.c.b16 %v1018_v11, %v1017_v16 }
 0x1e0   : > { %1580 = vst [vmem:[%s2196_s15 + $0x78] sm:$0xff] %v1564_v20   ;;  %v1038_v34 = vunpack.c.l.b16 %v934_v19  ;;  %v861_v35 = vadd.f32 %v2188_v18, %v860_v23  ;;  %v1052_v12 = vpack.c.b16 %v1034_v62, %v1033_v9  ;;  %v1015_v21 = vunpack.c.l.b16 %v911_v14 }
 0x1e2   : > { %v918_v43 = vpack.c.bf16 %v861_v35, %v861_v35  ;;  %v1524_v50 = vpack.c.bf16 %v861_v35, %v859_v13  ;;  %v1054_v51 = vpack.c.b16 %v1038_v34, %v1037_v29  ;;  %v1031_v13 = vunpack.c.l.b16 %v927_v2 }
 0x1e3   : > { %v1043_v29 = vpack.c.b16 %v1016_v31, %v1015_v21 }
 0x1e4   : > { %1572 = vst [vmem:[%s2196_s15 + $0x38] sm:$0xff] %v1524_v50   ;;  %v1022_v58 = vunpack.c.l.b16 %v918_v43  ;;  %1084 = vmatpush.bf16.msrb.mxu3 %v1054_v51  ;;  %v1051_v19 = vpack.c.b16 %v1032_v10, %v1031_v13 }
 0x1e6   : > { %v1046_v7 = vpack.c.b16 %v1022_v58, %v1021_v57 }
 0x1e7   : > { %v863_v8 = vpop.f32.mrf.mxu1 }
 0x1e8   : > { %1071 = vmatpush.bf16.msrb.mxu2 %v1046_v7  ;;  %1085 = vmatpush.bf16.msrb.mxu3 %v1053_v46  ;;  %v864_v37 = vadd.f32 %v2188_v18, %v863_v8 }
 0x1ec   : > { %1072 = vmatpush.bf16.msrb.mxu2 %v1045_v53  ;;  %1086 = vmatpush.bf16.msrb.mxu3 %v1052_v12 }
 0x1ef   : > { %v865_v20 = vpop.f32.mrf.mxu1 }
 0x1f0   : > { %1073 = vmatpush.bf16.msrb.mxu2 %v1044_v52  ;;  %1087 = vmatpush.bf16.msrb.mxu3 %v1051_v19  ;;  %v866_v23 = vadd.f32 %v2188_v18, %v865_v20  ;;  %v919_v18 = vpack.c.bf16 %v864_v37, %v864_v37 }
 0x1f2   : > { %v1529_v30 = vpack.c.bf16 %v866_v23, %v864_v37  ;;  %v920_v36 = vpack.c.bf16 %v866_v23, %v866_v23  ;;  %v1023_v15 = vunpack.c.l.b16 %v919_v18 }
 0x1f4   : > { %1074 = vmatpush.bf16.msrb.mxu2 %v1043_v29  ;;  %1088 = vmatpush.bf16.msrb.mxu3 %v1050_v22  ;;  %1573 = vst [vmem:[%s2196_s15 + $0x40] sm:$0xff] %v1529_v30   ;;  %v1024_v34 = vunpack.c.l.b16 %v920_v36 }
 0x1f6   : > { %v1047_v17 = vpack.c.b16 %v1024_v34, %v1023_v15 }
 0x1f8   : > { %1075 = vmatpush.bf16.msrb.mxu2 %v1042_v26  ;;  %1089 = vmatpush.bf16.msrb.mxu3 %v1049_v1 }
 0x1fc   : > { %1076 = vmatpush.bf16.msrb.mxu2 %v1041_v5  ;;  %1090 = vmatpush.bf16.msrb.mxu3 %v1048_v45 }
 0x200   : > { %1077 = vmatpush.bf16.msrb.mxu2 %v1040_v49  ;;  %1091 = vmatpush.bf16.msrb.mxu3 %v1047_v17 }
 0x203   : > { %1092 = vmatmul.bf16.vlgmr.msrb.gmra.mxu3 %v972_v59 }
 0x204   : > { %1078 = vmatpush.bf16.msrb.mxu2 %v1039_v28 }
 0x207   : > { %1079 = vmatmul.bf16.vlgmr.msrb.gmra.mxu2 %v971_v61 }
 0x208   : > { %1844 = shalt.err (!%p1841_p13)
}
 0x209   : > { %s1949_s30 = smov 64   ;;  %s1950_s10 = smov 4   ;;  %v1951_v27 = vmov 0.0  }
 0x20a   : > { %1609 = dma.vmem_to_hbm [thread:$0]  (%p2072_p2), %s1124_s16, 2048, %s1126_s17, %s1105_s2, %s1949_s30, %s1949_s30, %s1950_s10   ;;  %412 = vst [vmem:[#allocation2] sm:$0x3] %v1951_v27 }
 0x20b   : > { %s1449_s13 = sshll.u32 %s1935_s27, 1  ;;  %s2419_s9 = sld [smem:[#allocation27_spill]] }
 0x20c   : > { %s401_s23 = scalar_lea.vmem [#allocation12], %s1311_s4  ;;  %s1110_s17 = scalar_lea.sflag [#allocation13], %s2102_s22 }
 0x20d   : > { %s1140_s20 = sshll.u32 %s401_s23, 4  ;;  %s1141_s20 = int_to_ptr.vmem [resolvable:$true] %s1140_s20 }
 0x211   : > { %v967_v39 = vld [vmem:[#allocation2] sm:$0x3]  ;;  %s1138_s21 = scalar_lea.hbm %s2419_s9, %s1449_s13  ;;  %s1865_s24 = scalar_lea.hbm %s2419_s9, 4 }
 0x212   : > { %s1142_s16 = sshll.u32 %s1138_s21, 4  ;;  %s1143_s16 = int_to_ptr.hbm [resolvable:$true] %s1142_s16 }
 0x213   : > { %s1859_s2 = sshra.s32 %s1143_s16, 4  ;;  %s1860_s2 = int_to_ptr.hbm [resolvable:$true] %s1859_s2 }
 0x214   : > { %s1861_s27 = scalar_lea.hbm %s1860_s2, 2  ;;  %p1866_p8 = scmp.lt.s32.totalorder %s1860_s2, %s2419_s9 }
 0x215   : > { %p1862_p0 = scmp.ne.s32.totalorder %s1860_s2, %s1861_s27  ;;  %p1867_p1 = scmp.lt.s32.totalorder %s1865_s24, %s1861_s27 }
 0x217   : > { %p1863_p4 = pnand %p1862_p0, %p2072_p2  ;;  %p1868_p3 = por %p1867_p1, %p1866_p8 }
 0x219   : > { %p1864_p7 = pneg %p1863_p4 }
 0x21b   : > { %p1869_p9 = pnand %p1868_p3, %p1864_p7 }
 0x286   : > { %v1093_v33 = vpop.f32.mrf.mxu3 }
 0x28a   : > { %v1080_v28 = vpop.f32.mrf.mxu2 }
 0x28b   : > { %v1094_v41 = vadd.f32 %v1093_v33, %v1080_v28 }
 0x28d   : > { %v1097_v45 = vadd.f32 %v1094_v41, %v967_v39 }
 0x28e   : > { %v1095_v47 = vpop.f32.mrf.mxu3 }
 0x28f   : > { %1098 = vst [vmem:[#allocation2] sm:$0x3] %v1097_v45 }
 0x292   : > { %v1082_v48 = vpop.f32.mrf.mxu2 }
 0x296   : > { %v1102_v49 = vld [vmem:[#allocation2] sm:$0x3] }
 0x297   : > { %1103 = vst [vmem:[%s401_s23] sm:$0x3] %v1102_v49 }
 0x298   : > { %1872 = shalt.err (!%p1869_p9)
}
 0x299   : > { %1610 = dma.vmem_to_hbm [thread:$0]  (%p2072_p2), %s1141_s20, 32, %s1143_s16, %s1110_s17  }
 0x29a PF: > { %s2420_s22 = sld [smem:[#allocation20_spill]]  ;;  %p1628_p10 = pnand %p1304_p6, %p2079_p5 }
 0x29c   : > { %p1629_p11 = pneg %p1628_p10 }
 0x2a0   : > { %s1154_s18 = sand.u32 1, %s2420_s22  }
 0x2a1   : > { %s1155_s8 = scalar_lea.sflag [#allocation5], %s1154_s18 }
 0x2a2   : > { %1914 = dma.done.wait (%p1629_p11), %s1155_s8, 2048  }
 0x2a3   : > { %1916 = vsyncadd (%p1629_p11), %s1155_s8, 4294965248  ;;  %s1165_s30 = scalar_lea.sflag [#allocation13], %s1154_s18 }
 0x2a4   : > { %1918 = dma.done.wait (%p1629_p11), %s1165_s30, 32  }
 0x2a5   : > { %1920 = vsyncadd (%p1629_p11), %s1165_s30, 4294967264  ;;  %s31_s29 = sadd.s32 1, %s1943_s29   ;;  %s2422_s12 = sld [smem:[#allocation21_spill]] }
 0x2a6   : > { %p28_p12 = scmp.ge.s32.totalorder %s31_s29, 4   ;;  %s2423_s26 = sld [smem:[#allocation23_spill]] }
 0x2a7   : > { %s2424_s10 = sld [smem:[#allocation22_spill]]  ;;  %s2425_s24 = smov %s1927_s25 }
 0x2a8   : > { %s2427_s27 = smov %s1939_s28 }
 0x2a9   :  { %30 = sbr.rel (!%p28_p12) target bundleno = 15 (0xf), region = 135 }
 0x2ab   : > { %s2426_s25 = smov %s2422_s12 }
 0x2ad   : > { %s2428_s28 = smov %s2424_s10 }
 0x2ae   :  { %1171 = vsyncpa [#allocation4], 1 }
 0x2af   :  { %1173 = vsyncpa [#allocation4 + $0x1], 1 }
 0x2b0   :  { %1174 = vsyncpa [#allocation7], 1 }
 0x2b1   :  { %1176 = vsyncpa [#allocation7 + $0x1], 1 }
 0x2b2   :  { %1177 = vsyncpa [#allocation10], 1 }
 0x2b3   :  { %1178 = vsyncpa [#allocation5], 1 }
 0x2b4   :  { %1180 = vsyncpa [#allocation5 + $0x1], 1 }
 0x2b5   :  { %1181 = vsyncpa [#allocation13], 1 }
 0x2b6   :  { %1183 = vsyncpa [#allocation13 + $0x1], 1 }

</bundles_post_ra>
